<compile_context>
chip_gen: v5e
topology: v5e:2x2
jax: 0.10.0
libtpu: 0.0.40
codegen_flags: <defaults>
</compile_context>

<pallas_src>
import math

import jax
import jax.numpy as jnp
import numpy as np
from jax.experimental import pallas as pl
from jax.experimental.pallas import tpu as pltpu

# ---- problem sizes (consistent with the module) -----------------------------
B = 2
S = 8
D_MODEL = 32
NHEAD = 4
HEAD_DIM = D_MODEL // NHEAD          # 8
R = NHEAD * S                        # packed (head, key) dimension = 32


# -----------------------------------------------------------------------------
# Fused kernel: QKV projection + all-head softmax attention, entirely in VMEM.
#   x_ref:        (B*S, D)    input tokens (batch flattened into rows)
#   w_qkv_ref:    (D, 3D)     [Wq*scale | Wk | Wv], stored (in_features, out)
#   b_qkv_ref:    (1, 3D)     [bq*scale | bk | bv]
#   kv_mask_ref:  (R, D)      1 where (r // S) == (d // HEAD_DIM), else 0
#   seg_mask_ref: (R, R)      1 where (r // S) == (r' // S), else 0
#   o_ref:        (B*S, D)    concatenated head outputs
# -----------------------------------------------------------------------------
def _temporal_attention_kernel(x_ref, w_qkv_ref, b_qkv_ref, kv_mask_ref,
                               seg_mask_ref, o_ref):
    x = x_ref[...]                                               # (B*S, D)

    # Fused QKV projection: one MXU push + one bias add (instead of three).
    qkv = jnp.dot(x, w_qkv_ref[...],
                  preferred_element_type=jnp.float32) + b_qkv_ref[...]  # (B*S, 3D)

    # Static lane slices, then cheap sublane-split reshape to (B, S, D).
    q = qkv[:, 0 * D_MODEL:1 * D_MODEL].reshape(B, S, D_MODEL)
    k = qkv[:, 1 * D_MODEL:2 * D_MODEL].reshape(B, S, D_MODEL)
    v = qkv[:, 2 * D_MODEL:3 * D_MODEL].reshape(B, S, D_MODEL)

    kv_mask = kv_mask_ref[...]      # (R, D)
    seg_mask = seg_mask_ref[...]    # (R, R)

    # Block-diagonal head packing (no transposes, no per-head loop):
    #   k_exp[b, h*S + j, d] = k[b, j, d] if d belongs to head h else 0
    #   v_exp[b, h*S + j, c] = v[b, j, c] if c belongs to head h else 0
    k_exp = jnp.tile(k, (1, NHEAD, 1)) * kv_mask                 # (B, R, D)
    v_exp = jnp.tile(v, (1, NHEAD, 1)) * kv_mask                 # (B, R, D)

    # scores[b, i, h*S + j] = <q[b, i, head h dims], k[b, j, head h dims]>
    # (attention scale already folded into Wq/bq host-side)
    s = jnp.einsum('bqd,brd->bqr', q, k_exp,
                   preferred_element_type=jnp.float32)           # (B, S, R)

    # Softmax over each head's S-lane block.  Subtracting the global row max
    # is exact (constant within every block) and numerically safe here.
    s = s - jnp.max(s, axis=-1, keepdims=True)
    p = jnp.exp(s)

    # Per-block sums, lane-broadcast back across each block, via one matmul.
    p_flat = p.reshape(B * S, R)
    denom = jnp.dot(p_flat, seg_mask, preferred_element_type=jnp.float32)
    p = (p_flat * pl.reciprocal(denom, approx=True)).reshape(B, S, R)  # EUP slot

    # out[b, i, c] = sum_j p[b, i, (c // HEAD_DIM)*S + j] * v[b, j, c]
    o = jnp.einsum('bqr,brc->bqc', p, v_exp,
                   preferred_element_type=jnp.float32)           # (B, S, D)

    # Single full-width store (no masked partial lane writes).
    o_ref[...] = o.reshape(B * S, D_MODEL).astype(o_ref.dtype)


# -----------------------------------------------------------------------------
# One-time host-side parameter prep (PyTorch layout: W (out, in), b (out,)).
# -----------------------------------------------------------------------------
def prepare_params(wq, bq, wk, bk, wv, bv):
    scale = 1.0 / math.sqrt(HEAD_DIM)
    w_qkv = jnp.concatenate([wq.T * scale, wk.T, wv.T], axis=1).astype(jnp.float32)   # (D, 3D)
    b_qkv = jnp.concatenate([bq * scale, bk, bv]).reshape(1, 3 * D_MODEL).astype(jnp.float32)

    r_idx = np.arange(R)
    kv_mask = (r_idx[:, None] // S ==
               np.arange(D_MODEL)[None, :] // HEAD_DIM).astype(np.float32)            # (R, D)
    seg_mask = (r_idx[:, None] // S == r_idx[None, :] // S).astype(np.float32)        # (R, R)
    return w_qkv, b_qkv, jnp.asarray(kv_mask), jnp.asarray(seg_mask)


# -----------------------------------------------------------------------------
# Wrapper: single grid-less pallas_call; everything resident in VMEM.
# -----------------------------------------------------------------------------
@jax.jit
def temporal_attention(x, w_qkv, b_qkv, kv_mask, seg_mask):
    Bv, Sv, Dv = x.shape
    x_flat = x.reshape(Bv * Sv, Dv).astype(jnp.float32)

    vmem = pl.BlockSpec(memory_space=pltpu.MemorySpace.VMEM)
    out_flat = pl.pallas_call(
        _temporal_attention_kernel,
        out_shape=jax.ShapeDtypeStruct((Bv * Sv, Dv), jnp.float32),
        in_specs=[vmem] * 5,
        out_specs=vmem,
    )(x_flat, w_qkv, b_qkv, kv_mask, seg_mask)

    return out_flat.reshape(Bv, Sv, Dv)


# -----------------------------------------------------------------------------
# Pure-JAX reference mirroring the PyTorch forward exactly.
# -----------------------------------------------------------------------------
def reference_forward(x, wq, bq, wk, bk, wv, bv):
    Bv, Sv, Dv = x.shape
    q = (x @ wq.T + bq).reshape(Bv, Sv, NHEAD, HEAD_DIM).transpose(0, 2, 1, 3)
    k = (x @ wk.T + bk).reshape(Bv, Sv, NHEAD, HEAD_DIM).transpose(0, 2, 1, 3)
    v = (x @ wv.T + bv).reshape(Bv, Sv, NHEAD, HEAD_DIM).transpose(0, 2, 1, 3)
    attn = jnp.einsum('bhqd,bhkd->bhqk', q, k) / math.sqrt(HEAD_DIM)
    attn = jax.nn.softmax(attn, axis=-1)
    o = jnp.einsum('bhqk,bhkd->bhqd', attn, v)
    return o.transpose(0, 2, 1, 3).reshape(Bv, Sv, Dv)


if __name__ == "__main__":
    key = jax.random.PRNGKey(0)
    kx, kq, kbq, kk, kbk, kv, kbv = jax.random.split(key, 7)

    x = jax.random.normal(kx, (B, S, D_MODEL), dtype=jnp.float32)
    lim = 1.0 / math.sqrt(D_MODEL)
    wq = jax.random.uniform(kq, (D_MODEL, D_MODEL), jnp.float32, -lim, lim)
    bq = jax.random.uniform(kbq, (D_MODEL,), jnp.float32, -lim, lim)
    wk = jax.random.uniform(kk, (D_MODEL, D_MODEL), jnp.float32, -lim, lim)
    bk = jax.random.uniform(kbk, (D_MODEL,), jnp.float32, -lim, lim)
    wv = jax.random.uniform(kv, (D_MODEL, D_MODEL), jnp.float32, -lim, lim)
    bv = jax.random.uniform(kbv, (D_MODEL,), jnp.float32, -lim, lim)

    # One-time prep (analog of module construction), reused for every call.
    params = prepare_params(wq, bq, wk, bk, wv, bv)
    params = jax.block_until_ready(params)

    out = temporal_attention(x, *params)
    out = jax.block_until_ready(out)

    ref = reference_forward(x, wq, bq, wk, bk, wv, bv)
    ref = jax.block_until_ready(ref)

    assert out.shape == (B, S, D_MODEL), out.shape
    assert jnp.allclose(out, ref, atol=2e-3, rtol=2e-3), (out, ref)
    print("KERNEL_OK")
</pallas_src>

<mosaic_0001>
module attributes {stable_mosaic.version = 11 : i64} {
  func.func @_temporal_attention_kernel(%arg0: memref<16x32xf32, #tpu.memory_space<vmem>>, %arg1: memref<32x96xf32, #tpu.memory_space<vmem>>, %arg2: memref<1x96xf32, #tpu.memory_space<vmem>>, %arg3: memref<32x32xf32, #tpu.memory_space<vmem>>, %arg4: memref<32x32xf32, #tpu.memory_space<vmem>>, %arg5: memref<16x32xf32, #tpu.memory_space<vmem>>) attributes {dimension_semantics = [], scalar_prefetch = 0 : i64, scratch_operands = 0 : i64, tpu.core_type = #tpu.core_type<tc>} {
    %c0 = arith.constant 0 : index
    %c0_0 = arith.constant 0 : index
    %0 = vector.load %arg0[%c0, %c0_0] : memref<16x32xf32, #tpu.memory_space<vmem>>, vector<16x32xf32>
    %c0_1 = arith.constant 0 : index
    %c0_2 = arith.constant 0 : index
    %1 = vector.load %arg1[%c0_1, %c0_2] : memref<32x96xf32, #tpu.memory_space<vmem>>, vector<32x96xf32>
    %cst = arith.constant dense<0.000000e+00> : vector<16x96xf32>
    %2 = tpu.matmul %0, %1, %cst {dimension_numbers = #tpu.dot_dimension_numbers<[1], [0], [0], [1], [0, 0, 1, 1], [], []>} : vector<16x32xf32>, vector<32x96xf32>, vector<16x96xf32> -> vector<16x96xf32>
    %c0_3 = arith.constant 0 : index
    %c0_4 = arith.constant 0 : index
    %3 = vector.load %arg2[%c0_3, %c0_4] : memref<1x96xf32, #tpu.memory_space<vmem>>, vector<1x96xf32>
    %4 = vector.broadcast %3 : vector<1x96xf32> to vector<16x96xf32>
    %5 = arith.addf %2, %4 : vector<16x96xf32>
    %6 = vector.extract_strided_slice %5 {offsets = [0, 0], sizes = [16, 32], strides = [1, 1]} : vector<16x96xf32> to vector<16x32xf32>
    %7 = vector.shape_cast %6 : vector<16x32xf32> to vector<2x8x32xf32>
    %8 = vector.extract_strided_slice %5 {offsets = [0, 32], sizes = [16, 32], strides = [1, 1]} : vector<16x96xf32> to vector<16x32xf32>
    %9 = vector.shape_cast %8 : vector<16x32xf32> to vector<2x8x32xf32>
    %10 = vector.extract_strided_slice %5 {offsets = [0, 64], sizes = [16, 32], strides = [1, 1]} : vector<16x96xf32> to vector<16x32xf32>
    %11 = vector.shape_cast %10 : vector<16x32xf32> to vector<2x8x32xf32>
    %c0_5 = arith.constant 0 : index
    %c0_6 = arith.constant 0 : index
    %12 = vector.load %arg3[%c0_5, %c0_6] : memref<32x32xf32, #tpu.memory_space<vmem>>, vector<32x32xf32>
    %c0_7 = arith.constant 0 : index
    %c0_8 = arith.constant 0 : index
    %13 = vector.load %arg4[%c0_7, %c0_8] : memref<32x32xf32, #tpu.memory_space<vmem>>, vector<32x32xf32>
    %14 = tpu.concatenate %9, %9, %9, %9 in 1 : vector<2x8x32xf32>, vector<2x8x32xf32>, vector<2x8x32xf32>, vector<2x8x32xf32> -> vector<2x32x32xf32>
    %15 = vector.shape_cast %12 : vector<32x32xf32> to vector<1x32x32xf32>
    %16 = vector.broadcast %15 : vector<1x32x32xf32> to vector<2x32x32xf32>
    %17 = arith.mulf %14, %16 : vector<2x32x32xf32>
    %18 = tpu.concatenate %11, %11, %11, %11 in 1 : vector<2x8x32xf32>, vector<2x8x32xf32>, vector<2x8x32xf32>, vector<2x8x32xf32> -> vector<2x32x32xf32>
    %19 = vector.shape_cast %12 : vector<32x32xf32> to vector<1x32x32xf32>
    %20 = vector.broadcast %19 : vector<1x32x32xf32> to vector<2x32x32xf32>
    %21 = arith.mulf %18, %20 : vector<2x32x32xf32>
    "tpu.trace_start"() <{level = 10 : i32, message = "bqd,brd->bqr"}> : () -> ()
    %cst_9 = arith.constant dense<0.000000e+00> : vector<2x8x32xf32>
    %22 = tpu.matmul %7, %17, %cst_9 {dimension_numbers = #tpu.dot_dimension_numbers<[2], [2], [1], [1], [0, 0, 0, 1, 1, 1], [0], [0]>} : vector<2x8x32xf32>, vector<2x32x32xf32>, vector<2x8x32xf32> -> vector<2x8x32xf32>
    "tpu.trace_stop"() : () -> ()
    %cst_10 = arith.constant dense<0xFF800000> : vector<2x8xf32>
    %23 = vector.multi_reduction <maximumf>, %22, %cst_10 [2] : vector<2x8x32xf32> to vector<2x8xf32>
    %24 = vector.shape_cast %23 : vector<2x8xf32> to vector<2x8x1xf32>
    %25 = vector.broadcast %24 : vector<2x8x1xf32> to vector<2x8x32xf32>
    %26 = arith.subf %22, %25 : vector<2x8x32xf32>
    %27 = math.exp %26 : vector<2x8x32xf32>
    %28 = vector.shape_cast %27 : vector<2x8x32xf32> to vector<16x32xf32>
    %cst_11 = arith.constant dense<0.000000e+00> : vector<16x32xf32>
    %29 = tpu.matmul %28, %13, %cst_11 {dimension_numbers = #tpu.dot_dimension_numbers<[1], [0], [0], [1], [0, 0, 1, 1], [], []>} : vector<16x32xf32>, vector<32x32xf32>, vector<16x32xf32> -> vector<16x32xf32>
    %30 = tpu.reciprocal %29 {approx = true} : vector<16x32xf32> -> vector<16x32xf32>
    %31 = arith.mulf %28, %30 : vector<16x32xf32>
    %32 = vector.shape_cast %31 : vector<16x32xf32> to vector<2x8x32xf32>
    "tpu.trace_start"() <{level = 10 : i32, message = "bqr,brc->bqc"}> : () -> ()
    %cst_12 = arith.constant dense<0.000000e+00> : vector<2x8x32xf32>
    %33 = tpu.matmul %32, %21, %cst_12 {dimension_numbers = #tpu.dot_dimension_numbers<[2], [1], [1], [2], [0, 0, 0, 1, 1, 2], [0], [0]>} : vector<2x8x32xf32>, vector<2x32x32xf32>, vector<2x8x32xf32> -> vector<2x8x32xf32>
    "tpu.trace_stop"() : () -> ()
    %34 = vector.shape_cast %33 : vector<2x8x32xf32> to vector<16x32xf32>
    %c0_13 = arith.constant 0 : index
    %c0_14 = arith.constant 0 : index
    %35 = vector.load %arg5[%c0_13, %c0_14] : memref<16x32xf32, #tpu.memory_space<vmem>>, vector<16x32xf32>
    tpu.vector_store %arg5[%c0_13, %c0_14], %34 {strides = array<i32>} : memref<16x32xf32, #tpu.memory_space<vmem>>, vector<16x32xf32>,
    return
  }
}

</mosaic_0001>

<bundles_post_ra>
// kernel: temporal_attention.1
= control target key start
LH: loop header
LB: loop body
LE: loop exit
PB: predicated region body
PF: predicated region fallthrough
CT: control target
= control target key end

     0   :  { %10 = vsyncpa [#allocation3], 0  ;;  %s714_s0 = inlined_call_operand.hbm [shape: f32[16,32], index: 0, kind: input, shape index: {}]   ;;  %s715_s1 = inlined_call_operand.hbm [shape: f32[32,96], index: 1, kind: input, shape index: {}]   ;;  %s716_s2 = inlined_call_operand.vmem [shape: f32[1,96], index: 2, kind: input, shape index: {}]   ;;  %s717_s3 = inlined_call_operand.hbm [shape: f32[32,32], index: 3, kind: input, shape index: {}]   ;;  %s718_s4 = inlined_call_operand.hbm [shape: f32[32,32], index: 4, kind: input, shape index: {}]   ;;  %s719_s5 = inlined_call_operand.hbm [shape: f32[16,32], index: 5, kind: output, shape index: {}]  }
   0x1   :  { %11 = vsyncpa [#allocation6], 0 }
   0x2   :  { %12 = vsyncpa [#allocation9], 0 }
   0x3   :  { %13 = vsyncpa [#allocation4], 0  ;;  %s31_s20 = sshll.u32 %s715_s1, 4  ;;  %s591_s21 = smov [#allocation5]   ;;  %s32_s20 = int_to_ptr.hbm [resolvable:$true] %s31_s20 }
   0x4   :  { %s33_s22 = sshll.u32 %s591_s21, 4  ;;  %s18_s25 = sshll.u32 %s714_s0, 4  ;;  %s34_s22 = int_to_ptr.vmem [resolvable:$true] %s33_s22  ;;  %s19_s25 = int_to_ptr.hbm [resolvable:$true] %s18_s25 }
   0x5   :  { %s592_s26 = smov 128   ;;  %s593_s27 = smov 8  }
   0x6   :  { %39 = dma.hbm_to_vmem [thread:$0]  %s32_s20, 512, %s34_s22, [#allocation6], %s592_s26, %s592_s26, %s593_s27  }
   0x7   :  { %s594_s28 = smov [#allocation2]   ;;  %s46_s1 = sshll.u32 %s717_s3, 4  ;;  %s47_s1 = int_to_ptr.hbm [resolvable:$true] %s46_s1 }
   0x8   :  { %s20_s29 = sshll.u32 %s594_s28, 4  ;;  %s59_s8 = sshll.u32 %s718_s4, 4  ;;  %s21_s29 = int_to_ptr.vmem [resolvable:$true] %s20_s29  ;;  %s60_s8 = int_to_ptr.hbm [resolvable:$true] %s59_s8 }
   0x9   :  { %26 = dma.hbm_to_vmem [thread:$0]  %s19_s25, 256, %s21_s29, [#allocation3], %s592_s26, %s592_s26, %s593_s27  }
   0xa   :  { %s595_s9 = smov [#allocation7]   ;;  %s596_s11 = smov [#allocation8]  }
   0xb   :  { %s48_s10 = sshll.u32 %s595_s9, 4  ;;  %s61_s3 = sshll.u32 %s596_s11, 4  ;;  %s49_s10 = int_to_ptr.vmem [resolvable:$true] %s48_s10  ;;  %s62_s3 = int_to_ptr.vmem [resolvable:$true] %s61_s3 }
   0xc   :  { %54 = dma.hbm_to_vmem [thread:$0]  %s47_s1, 512, %s49_s10, [#allocation6], %s592_s26, %s592_s26, %s593_s27  }
   0xd   :  { %67 = dma.hbm_to_vmem [thread:$0]  %s60_s8, 512, %s62_s3, [#allocation9], %s592_s26, %s592_s26, %s593_s27  }
   0xe   :  { %583 = dma.done.wait [#allocation3], 256  }
   0xf   :  { %584 = vsyncadd [#allocation3], 4294967040 }
  0x10   :  { %585 = dma.done.wait [#allocation6], 1024  }
  0x11   :  { %586 = vsyncadd [#allocation6], 4294966272 }
  0x12   :  { %587 = dma.done.wait [#allocation9], 512  }
  0x13   :  { %588 = vsyncadd [#allocation9], 4294966784  ;;  %v89_v0 = vld [vmem:[#allocation5 + $0x18] sm:$0xff]  ;;  %v88_v1 = vld [vmem:[#allocation5 + $0x10] sm:$0xff]  ;;  %s597_s4 = smov 32   ;;  %vm94_vm0 = vcmask 261120  }
  0x14   :  { %113 = vmatpush.msra.mxu0 %v89_v0  ;;  %v127_v2 = vld [vmem:[#allocation7 + $0x18] sm:$0xff]  ;;  %v87_v3 = vld [vmem:[#allocation5 + $0x8] sm:$0xff]  ;;  %v86_v5 = vld [vmem:[#allocation5] sm:$0xff]  ;;  %s598_s14 = smov 96   ;;  %s600_s15 = smov [#allocation10]  }
  0x15   :  { %142 = vrot.lane.b32.xlu0 %v127_v2, %s597_s4  ;;  %v125_v4 = vld [vmem:[#allocation7 + $0x8] sm:$0xff]  ;;  %v84_v6 = vld [vmem:[#allocation2] sm:$0xff]  ;;  %v124_v8 = vld [vmem:[#allocation7] sm:$0xff]  ;;  %s391_s16 = sshll.u32 %s600_s15, 4  ;;  %s393_s19 = sshll.u32 %s719_s5, 4  ;;  %s392_s16 = int_to_ptr.vmem [resolvable:$true] %s391_s16  ;;  %s394_s19 = int_to_ptr.hbm [resolvable:$true] %s393_s19 }
  0x16   :  { %114 = vmatpush.msra.mxu0 %v88_v1  ;;  %138 = vrot.lane.b32.xlu1 %v125_v4, %s597_s4  ;;  %v126_v7 = vld [vmem:[#allocation7 + $0x10] sm:$0xff]  ;;  %v85_v9 = vld [vmem:[#allocation2 + $0x8] sm:$0xff]  ;;  %v129_v63 = vld [vmem:[#allocation8 + $0x8] sm:$0xff] }
  0x17   :  { %v454_v11 = vld [vmem:[%s716_s2] ss:$0 sm:$0xff]  ;;  %s599_s2 = smov 64   ;;  %v131_v61 = vld [vmem:[#allocation8 + $0x18] sm:$0xff]  ;;  %v128_v0 = vld [vmem:[#allocation8] sm:$0xff] }
  0x18   :  { %115 = vmatpush.msra.mxu0 %v87_v3  ;;  %292 = vmatpush.msra.mxu3 %v131_v61  ;;  %v130_v62 = vld [vmem:[#allocation8 + $0x10] sm:$0xff] }
  0x1a   :  { %116 = vmatpush.msra.mxu0 %v86_v5  ;;  %293 = vmatpush.msra.mxu3 %v130_v62 }
  0x1b   :  { %408 = vmatmul.msk.f32.vlgmr.msra.gmra.mxu0 %vm94_vm0, %v84_v6 }
  0x1c   :  { %294 = vmatpush.msra.mxu3 %v129_v63 }
  0x1d   :  { %140 = vrot.lane.b32.xlu0 %v126_v7, %s597_s4 }
  0x1e   :  { %136 = vrot.lane.b32.xlu1 %v124_v8, %s597_s4  ;;  %295 = vmatpush.msra.mxu3 %v128_v0 }
  0x23   :  { %409 = vmatmul.msk.f32.gmra.mxu0 %vm94_vm0, %v85_v9 }
  0x87   :  { %v143_v10 = vpop.permute.xlu0 %142 }
  0x88   :  { %v139_v17 = vpop.permute.xlu1 %138 }
  0x8f   :  { %v141_v13 = vpop.permute.xlu0 %140 }
  0x90   :  { %v137_v23 = vpop.permute.xlu1 %136 }
  0x98   :  { %v118_v12 = vpop.f32.mrf.mxu0 }
  0x99   :  { %v660_v14 = vadd.f32 %v454_v11, %v118_v12 }
  0x9b   :  { %v150_v15 = vmul.f32 %v141_v13, %v660_v14  ;;  %v151_v16 = vmul.f32 %v143_v10, %v660_v14  ;;  %v148_v24 = vmul.f32 %v137_v23, %v660_v14  ;;  %v149_v25 = vmul.f32 %v139_v17, %v660_v14 }
  0x9d   :  { %186 = vrot.lane.b32.xlu2 %v151_v16, %s598_s14  ;;  %184 = vrot.lane.b32.xlu0 %v150_v15, %s598_s14 }
  0xa0   :  { %v121_v18 = vpop.f32.mrf.mxu0 }
  0xa1   :  { %v664_v19 = vadd.f32 %v454_v11, %v121_v18 }
  0xa3   :  { %v154_v20 = vmul.f32 %v141_v13, %v664_v19  ;;  %v155_v21 = vmul.f32 %v143_v10, %v664_v19  ;;  %v153_v22 = vmul.f32 %v139_v17, %v664_v19  ;;  %v152_v26 = vmul.f32 %v137_v23, %v664_v19 }
  0xa5   :  { %227 = vrot.lane.b32.xlu1 %v154_v20, %s598_s14  ;;  %229 = vrot.lane.b32.xlu2 %v155_v21, %s598_s14 }
  0xa6   :  { %225 = vrot.lane.b32.xlu0 %v153_v22, %s598_s14 }
  0xad   :  { %182 = vrot.lane.b32.xlu2 %v149_v25, %s598_s14  ;;  %180 = vrot.lane.b32.xlu1 %v148_v24, %s598_s14 }
  0xb5   :  { %223 = vrot.lane.b32.xlu2 %v152_v26, %s598_s14 }
  0xbd   :  { %162 = vrot.lane.b32.xlu2 %v127_v2, %s599_s2 }
  0xc5   :  { %160 = vrot.lane.b32.xlu2 %v126_v7, %s599_s2 }
  0xcd   :  { %158 = vrot.lane.b32.xlu2 %v125_v4, %s599_s2 }
  0xd5   :  { %156 = vrot.lane.b32.xlu2 %v124_v8, %s599_s2 }
  0xf7   :  { %v187_v27 = vpop.permute.xlu2 %186 }
  0xf8   :  { %410 = vmatpush.xpose.msk.msra.mxu1 %vm94_vm0, %v187_v27 }
  0xff   :  { %v230_v28 = vpop.permute.xlu2 %229 }
 0x100   :  { %415 = vmatpush.xpose.msk.msra.mxu2 %vm94_vm0, %v230_v28 }
 0x107   :  { %v183_v29 = vpop.permute.xlu2 %182 }
 0x10f   :  { %v185_v30 = vpop.permute.xlu0 %184  ;;  %v224_v31 = vpop.permute.xlu2 %223 }
 0x110   :  { %411 = vmatpush.xpose.msk.msra.mxu1 %vm94_vm0, %v185_v30 }
 0x114   :  { %412 = vmatpush.xpose.msk.msra.mxu1 %vm94_vm0, %v183_v29 }
 0x117   :  { %v228_v32 = vpop.permute.xlu1 %227  ;;  %v163_v33 = vpop.permute.xlu2 %162 }
 0x118   :  { %v171_v34 = vmul.f32 %v163_v33, %v660_v14  ;;  %v175_v35 = vmul.f32 %v163_v33, %v664_v19  ;;  %416 = vmatpush.xpose.msk.msra.mxu2 %vm94_vm0, %v228_v32  ;;  %v226_v37 = vpop.permute.xlu0 %225 }
 0x11a   :  { %v434_v36 = vpack.i.bf16 %v175_v35, %v171_v34 }
 0x11c   :  { %417 = vmatpush.xpose.msk.msra.mxu2 %vm94_vm0, %v226_v37  ;;  %435 = vrot.lane.b32.xlu2 %v434_v36, %s599_s2 }
 0x11f   :  { %v161_v38 = vpop.permute.xlu2 %160  ;;  %v181_v39 = vpop.permute.xlu1 %180 }
 0x120   :  { %v170_v40 = vmul.f32 %v161_v38, %v660_v14  ;;  %v174_v41 = vmul.f32 %v161_v38, %v664_v19  ;;  %413 = vmatpush.xpose.msk.msra.mxu1 %vm94_vm0, %v181_v39  ;;  %418 = vmatpush.xpose.msk.msra.mxu2 %vm94_vm0, %v224_v31 }
 0x122   :  { %v439_v42 = vpack.i.bf16 %v174_v41, %v170_v40 }
 0x123   :  { %414 = vmatmul.msk.f32.vlgmr.msra.gmra.mxu1 %vm94_vm0, %v660_v14  ;;  %419 = vmatmul.msk.f32.vlgmr.msra.gmra.mxu2 %vm94_vm0, %v664_v19 }
 0x124   :  { %440 = vrot.lane.b32.xlu2 %v439_v42, %s599_s2 }
 0x127   :  { %v159_v43 = vpop.permute.xlu2 %158 }
 0x128   :  { %v169_v55 = vmul.f32 %v159_v43, %v660_v14  ;;  %v173_v56 = vmul.f32 %v159_v43, %v664_v19 }
 0x12a   :  { %v444_v57 = vpack.i.bf16 %v173_v56, %v169_v55 }
 0x12f   :  { %v157_v44 = vpop.permute.xlu2 %156 }
 0x130   :  { %v168_v58 = vmul.f32 %v157_v44, %v660_v14  ;;  %v172_v59 = vmul.f32 %v157_v44, %v664_v19 }
 0x132   :  { %v449_v60 = vpack.i.bf16 %v172_v59, %v168_v58 }
 0x176   :  { %v436_v45 = vpop.permute.xlu2 %435 }
 0x177   :  { %v437_v46 = vunpack.i.l.bf16 %v436_v45  ;;  %v438_v47 = vunpack.i.h.bf16 %v436_v45 }
 0x179   :  { %338 = vmatpush.msrb.mxu0 %v437_v46  ;;  %377 = vmatpush.msrb.mxu1 %v438_v47 }
 0x17e   :  { %v441_v48 = vpop.permute.xlu2 %440 }
 0x17f   :  { %v443_v49 = vunpack.i.h.bf16 %v441_v48  ;;  %v442_v50 = vunpack.i.l.bf16 %v441_v48 }
 0x181   :  { %339 = vmatpush.msrb.mxu0 %v442_v50  ;;  %378 = vmatpush.msrb.mxu1 %v443_v49 }
 0x1a0   :  { %v216_v51 = vpop.f32.mrf.mxu1 }
 0x1a1   :  { %v262_v52 = vsel %vm94_vm0, %v216_v51, -inf }
 0x1a2   :  { %263 = vmax.xlane.f32.xlu0 %v262_v52 }
 0x1a6   :  { %v259_v53 = vpop.f32.mrf.mxu2 }
 0x1a7   :  { %v265_v54 = vsel %vm94_vm0, %v259_v53, -inf }
 0x1a8   :  { %266 = vmax.xlane.f32.xlu1 %v265_v54 }
 0x1b6   :  { %445 = vrot.lane.b32.xlu0 %v444_v57, %s599_s2 }
 0x1c1   :  { %450 = vrot.lane.b32.xlu1 %v449_v60, %s599_s2 }
 0x215   :  { %v264_v1 = vpop.xlane.xlu0 %263 }
 0x216   :  { %v268_v2 = vsub.f32 %v216_v51, %v264_v1 }
 0x218   :  { %v270_v3 = vmul.f32 1.442695, %v268_v2 }
 0x21a   :  { %455 = vpow2.f32 %v270_v3 }
 0x21b   :  { %v267_v4 = vpop.xlane.xlu1 %266 }
 0x21c   :  { %v269_v5 = vsub.f32 %v259_v53, %v267_v4 }
 0x21e   :  { %v272_v6 = vmul.f32 1.442695, %v269_v5 }
 0x220   :  { %v456_v7 = vpop.eup %455  ;;  %457 = vpow2.f32 %v272_v6 }
 0x221   :  { %420 = vmatmul.msk.f32.vlgmr.msra.gmra.mxu3 %vm94_vm0, %v456_v7 }
 0x226   :  { %v458_v8 = vpop.eup %457 }
 0x228   :  { %v446_v9 = vpop.permute.xlu0 %445 }
 0x229   :  { %v448_v10 = vunpack.i.h.bf16 %v446_v9  ;;  %v447_v11 = vunpack.i.l.bf16 %v446_v9  ;;  %421 = vmatmul.msk.f32.gmra.mxu3 %vm94_vm0, %v458_v8 }
 0x22b   :  { %340 = vmatpush.msrb.mxu0 %v447_v11  ;;  %379 = vmatpush.msrb.mxu1 %v448_v10 }
 0x233   :  { %v451_v12 = vpop.permute.xlu1 %450 }
 0x234   :  { %v453_v13 = vunpack.i.h.bf16 %v451_v12  ;;  %v452_v14 = vunpack.i.l.bf16 %v451_v12 }
 0x236   :  { %341 = vmatpush.msrb.mxu0 %v452_v14  ;;  %380 = vmatpush.msrb.mxu1 %v453_v13 }
 0x2a4   :  { %v297_v15 = vpop.f32.mrf.mxu3 }
 0x2a5   :  { %459 = vrcp.f32 %v297_v15 }
 0x2ab   :  { %v460_v16 = vpop.eup %459 }
 0x2ac   :  { %v300_v17 = vpop.f32.mrf.mxu3  ;;  %v305_v18 = vmul.f32 %v460_v16, %v456_v7 }
 0x2ad   :  { %461 = vrcp.f32 %v300_v17 }
 0x2ae   :  { %422 = vmatmul.msk.f32.vlgmr.msrb.gmra.mxu0 %vm94_vm0, %v305_v18 }
 0x2b3   :  { %v462_v19 = vpop.eup %461 }
 0x2b4   :  { %v306_v20 = vmul.f32 %v462_v19, %v458_v8 }
 0x2b6   :  { %423 = vmatmul.msk.f32.vlgmr.msrb.gmra.mxu1 %vm94_vm0, %v306_v20 }
 0x32b   :  { %v343_v21 = vpop.f32.mrf.mxu0 }
 0x32c   :  { %385 = vst.msk [vmem:[#allocation10] sm:$0xff] %vm94_vm0, %v343_v21 }
 0x333   :  { %v382_v22 = vpop.f32.mrf.mxu1 }
 0x334   :  { %386 = vst.msk [vmem:[#allocation10 + $0x8] sm:$0xff] %vm94_vm0, %v382_v22 }
 0x335   :  { %399 = dma.vmem_to_hbm [thread:$0]  %s392_s16, 256, %s394_s19, [#allocation4], %s592_s26, %s592_s26, %s593_s27  }
 0x336   :  { %589 = dma.done.wait [#allocation4], 256  }
 0x337   :  { %590 = vsyncadd [#allocation4], 4294967040 }
 0x338   :  { %404 = vsyncpa [#allocation3], 1 }
 0x339   :  { %405 = vsyncpa [#allocation6], 1 }
 0x33a   :  { %406 = vsyncpa [#allocation9], 1 }
 0x33b   :  { %407 = vsyncpa [#allocation4], 1 }

</bundles_post_ra>
